<compile_context>
chip_gen: v7x
topology: tpu7x:2x2x1
jax: 0.10.0
libtpu: 0.0.40
codegen_flags: <defaults>
</compile_context>

<pallas_src>
import functools
import numpy as np
import jax
import jax.numpy as jnp
from jax.experimental import pallas as pl
from jax.experimental.pallas import tpu as pltpu

_VMEM = pl.BlockSpec(memory_space=pltpu.MemorySpace.VMEM)
_BF16 = jnp.bfloat16


# ----------------------------------------------------------------------------
# Kernel 1: pathomics_fc (768->256->256, ReLU6) fused with ConfiNet_p_pre + mean + sigmoid
# ----------------------------------------------------------------------------
def _pathomics_kernel(x_ref, w1_ref, b1_ref, w2_ref, b2_ref, wcp_ref, bcp_ref,
                      feat_ref, tcp_ref):
    x = x_ref[...].astype(_BF16)                                              # (N, 768)
    h = jnp.dot(x, w1_ref[...], preferred_element_type=jnp.float32) + b1_ref[...]
    h = jnp.clip(h, 0.0, 6.0)                                                 # ReLU6
    h = jnp.dot(h.astype(_BF16), w2_ref[...], preferred_element_type=jnp.float32) + b2_ref[...]
    h = jnp.clip(h, 0.0, 6.0)                                                 # (N, 256)
    feat_ref[...] = h
    # ConfiNet_p_pre -> mean over patches -> sigmoid  (scalar confidence, no HBM round-trip)
    pre = jnp.dot(h.astype(_BF16), wcp_ref[...], preferred_element_type=jnp.float32) + bcp_ref[...]
    tcp_ref[...] = jax.nn.sigmoid(jnp.mean(pre, axis=0, keepdims=True))       # (1, 1)


def pathomics_and_conf(x, p):
    n = x.shape[0]
    return pl.pallas_call(
        _pathomics_kernel,
        out_shape=(jax.ShapeDtypeStruct((n, 256), jnp.float32),
                   jax.ShapeDtypeStruct((1, 1), jnp.float32)),
        in_specs=[_VMEM] * 7,
        out_specs=(_VMEM, _VMEM),
    )(x, p["path_w1"], p["path_b1"], p["path_w2"], p["path_b2"],
      p["confp_w"], p["confp_b"])


# ----------------------------------------------------------------------------
# Kernel 2: genomics_fc — all 6 SNN towers (Linear+ELU, Linear+ELU) in one call
# ----------------------------------------------------------------------------
def _genomics_kernel(x_ref, w1_ref, b1_ref, w2_ref, b2_ref, o_ref):
    n_omics = x_ref.shape[0]
    for i in range(n_omics):                      # static unroll, all data stays in VMEM
        xi = x_ref[pl.ds(i, 1), :].astype(_BF16)                              # (1, Kmax)
        h = jnp.dot(xi, w1_ref[i], preferred_element_type=jnp.float32) + b1_ref[i]
        h = jnp.where(h > 0, h, jnp.expm1(h))                                 # ELU
        h = jnp.dot(h.astype(_BF16), w2_ref[i], preferred_element_type=jnp.float32) + b2_ref[i]
        h = jnp.where(h > 0, h, jnp.expm1(h))                                 # (1, 256)
        o_ref[pl.ds(i, 1), :] = h


def genomics_fc(x_g, p):
    return pl.pallas_call(
        _genomics_kernel,
        out_shape=jax.ShapeDtypeStruct((x_g.shape[0], 256), jnp.float32),
        in_specs=[_VMEM] * 5,
        out_specs=_VMEM,
    )(x_g, p["gen_w1"], p["gen_b1"], p["gen_w2"], p["gen_b2"])


# ----------------------------------------------------------------------------
# Kernel 3: ConfidNet_g — 3 linears + sigmoid fused
# ----------------------------------------------------------------------------
def _confid_g_kernel(x_ref, w1_ref, b1_ref, w2_ref, b2_ref, w3_ref, b3_ref, o_ref):
    h = jnp.dot(x_ref[...].astype(_BF16), w1_ref[...],
                preferred_element_type=jnp.float32) + b1_ref[...]
    h = jnp.dot(h.astype(_BF16), w2_ref[...],
                preferred_element_type=jnp.float32) + b2_ref[...]
    h = jnp.dot(h.astype(_BF16), w3_ref[...],
                preferred_element_type=jnp.float32) + b3_ref[...]
    o_ref[...] = jax.nn.sigmoid(h)


def confid_g(gt, p):
    return pl.pallas_call(
        _confid_g_kernel,
        out_shape=jax.ShapeDtypeStruct((1, 1), jnp.float32),
        in_specs=[_VMEM] * 7,
        out_specs=_VMEM,
    )(gt, p["cg_w1"], p["cg_b1"], p["cg_w2"], p["cg_b2"], p["cg_w3"], p["cg_b3"])


# ----------------------------------------------------------------------------
# Kernel 4: three fused hypergraph-diffusion convs, single incidence copy
# ----------------------------------------------------------------------------
def _hgnn3_kernel(h_ref, x_ref, w_ref, b_ref, dv_ref, de_ref, o_ref):
    h_inc = h_ref[...]                                                        # (N, E) bf16
    x = x_ref[...]                                                            # (N, 256) f32
    for l in range(w_ref.shape[0]):
        # edge aggregation: De^-1 (H^T X) — contract H's node axis, no transposed copy of H
        edge = de_ref[...] * jax.lax.dot_general(
            h_inc, x.astype(_BF16),
            dimension_numbers=(((0,), (0,)), ((), ())),
            preferred_element_type=jnp.float32)                               # (E, 256)
        # node aggregation: Dv^-1 (H E)
        node = dv_ref[...] * jnp.dot(h_inc, edge.astype(_BF16),
                                     preferred_element_type=jnp.float32)      # (N, 256)
        x = jnp.dot(node.astype(_BF16), w_ref[l],
                    preferred_element_type=jnp.float32) + b_ref[l]
        # TODO(synk): F.dropout(p=0.25, training=True) between convs omitted for determinism.
    o_ref[...] = x


def hgnn_convs3(h_inc, x, p, dv_inv, de_inv):
    n = x.shape[0]
    return pl.pallas_call(
        _hgnn3_kernel,
        out_shape=jax.ShapeDtypeStruct((n, 256), jnp.float32),
        in_specs=[_VMEM] * 6,
        out_specs=_VMEM,
    )(h_inc, x, p["conv_w"], p["conv_b"], dv_inv, de_inv)


# ----------------------------------------------------------------------------
# Kernel 5: fused token-fusion head
#   QKV (packed) + 4-head attention + out-proj + residual + FFN + residual
#   + LayerNorm + pool genomics/WSI tokens + mm + classifier  ->  logits (1, n_classes)
# ----------------------------------------------------------------------------
def _fusion_head_kernel(t_ref, wqkv_ref, bqkv_ref, wo_ref, bo_ref,
                        wf1_ref, bf1_ref, wf2_ref, bf2_ref,
                        lng_ref, lnb_ref, wm_ref, bm_ref, wc_ref, bc_ref,
                        o_ref, *, n_heads, n_gen_tokens):
    t = t_ref[...]                                                            # (S, 256) f32
    s_len, d = t.shape
    hd = d // n_heads
    scale = 1.0 / float(np.sqrt(hd))

    # --- packed QKV projection: one MXU matmul ---
    qkv = jnp.dot(t.astype(_BF16), wqkv_ref[...],
                  preferred_element_type=jnp.float32) + bqkv_ref[...]         # (S, 3*256)

    # --- per-head attention (static unroll), output lane-dense (S, 256) ---
    heads_out = []
    for h in range(n_heads):
        q = qkv[:, h * hd:(h + 1) * hd]
        k = qkv[:, d + h * hd: d + (h + 1) * hd]
        v = qkv[:, 2 * d + h * hd: 2 * d + (h + 1) * hd]
        s = jax.lax.dot_general(q.astype(_BF16), k.astype(_BF16),
                                dimension_numbers=(((1,), (1,)), ((), ())),
                                preferred_element_type=jnp.float32) * scale   # (S, S)
        s = s - jnp.max(s, axis=-1, keepdims=True)
        pexp = jnp.exp(s)
        pexp = pexp * pl.reciprocal(jnp.sum(pexp, axis=-1, keepdims=True), approx=True)
        heads_out.append(jnp.dot(pexp.astype(_BF16), v.astype(_BF16),
                                 preferred_element_type=jnp.float32))         # (S, hd)
    attn = jnp.concatenate(heads_out, axis=-1)                                # (S, 256)
    attn = jnp.dot(attn.astype(_BF16), wo_ref[...],
                   preferred_element_type=jnp.float32) + bo_ref[...]
    x = t + attn                                                              # residual

    # --- feed forward + residual ---
    ff = jnp.dot(x.astype(_BF16), wf1_ref[...],
                 preferred_element_type=jnp.float32) + bf1_ref[...]
    ff = jnp.maximum(ff, 0.0)
    ff = jnp.dot(ff.astype(_BF16), wf2_ref[...],
                 preferred_element_type=jnp.float32) + bf2_ref[...]
    x = x + ff

    # --- layer norm ---
    mu = jnp.mean(x, axis=-1, keepdims=True)
    var = jnp.mean((x - mu) ** 2, axis=-1, keepdims=True)
    x = (x - mu) * jax.lax.rsqrt(var + 1e-5) * lng_ref[...] + lnb_ref[...]    # (S, 256)

    # --- pool genomic tokens (first n_gen_tokens) and WSI tokens (rest), masked means ---
    row = jax.lax.broadcasted_iota(jnp.int32, (s_len, 1), 0)
    gmask = (row < n_gen_tokens).astype(jnp.float32)
    paths = jnp.sum(x * gmask, axis=0, keepdims=True) * (1.0 / n_gen_tokens)
    wsi = jnp.sum(x * (1.0 - gmask), axis=0, keepdims=True) * (1.0 / (s_len - n_gen_tokens))
    fused = jnp.concatenate([paths, wsi], axis=-1)                            # (1, 512)

    # --- mm (Linear + ReLU) + classifier ---
    fused = jnp.dot(fused.astype(_BF16), wm_ref[...],
                    preferred_element_type=jnp.float32) + bm_ref[...]
    fused = jnp.maximum(fused, 0.0)
    o_ref[...] = jnp.dot(fused.astype(_BF16), wc_ref[...],
                         preferred_element_type=jnp.float32) + bc_ref[...]    # (1, n_classes)


def fusion_head(token, p, n_gen_tokens):
    n_classes = p["cls_w"].shape[1]
    return pl.pallas_call(
        functools.partial(_fusion_head_kernel, n_heads=4, n_gen_tokens=n_gen_tokens),
        out_shape=jax.ShapeDtypeStruct((1, n_classes), jnp.float32),
        in_specs=[_VMEM] * 15,
        out_specs=_VMEM,
    )(token, p["attn_wqkv"], p["attn_bqkv"], p["attn_wo"], p["attn_bo"],
      p["ff_w1"], p["ff_b1"], p["ff_w2"], p["ff_b2"],
      p["ln_g"], p["ln_b"], p["mm_w"], p["mm_b"], p["cls_w"], p["cls_b"])


# ----------------------------------------------------------------------------
# Host-side hypergraph glue (mirrors MRePath.get_hyperedge + incidence build)
# TODO(synk): cache per graph and/or use a sparse/segment formulation at N=4096.
# ----------------------------------------------------------------------------
def get_hyperedges(edge_np):
    hyperedges = {}
    for s, e in edge_np.T:
        hyperedges.setdefault(int(s), set()).add(int(e))
    out = []
    for s, ends in hyperedges.items():
        out.append(sorted({s} | ends))
    return out


def build_incidence(e_list, num_v):
    num_e = max(len(e_list), 1)
    h = np.zeros((num_v, num_e), np.float32)
    for j, nodes in enumerate(e_list):
        for v in nodes:
            h[v, j] = 1.0
    return h


# ----------------------------------------------------------------------------
# Parameter init (deterministic, synthetic). Matmul weights stored in bf16.
# ----------------------------------------------------------------------------
def _dense(key, fan_in, fan_out):
    scale = 1.0 / np.sqrt(fan_in)
    w = jax.random.uniform(key, (fan_in, fan_out), jnp.float32, -scale, scale).astype(_BF16)
    b = jnp.zeros((1, fan_out), jnp.float32)
    return w, b


def init_params(key, omic_sizes):
    keys = iter(jax.random.split(key, 64))
    p = {}
    # pathomics_fc: 768 -> 256 -> 256 (ReLU6; dropout inactive in eval)
    p["path_w1"], p["path_b1"] = _dense(next(keys), 768, 256)
    p["path_w2"], p["path_b2"] = _dense(next(keys), 256, 256)
    # genomics_fc (SNN blocks: Linear + ELU): omic -> 1024 -> 256, padded + stacked
    kmax = max(omic_sizes)
    w1s, b1s, w2s, b2s = [], [], [], []
    for sz in omic_sizes:
        w1, b1 = _dense(next(keys), sz, 1024)
        w2, b2 = _dense(next(keys), 1024, 256)
        w1s.append(jnp.zeros((kmax, 1024), _BF16).at[:sz].set(w1))
        b1s.append(b1)
        w2s.append(w2)
        b2s.append(b2)
    p["gen_w1"], p["gen_b1"] = jnp.stack(w1s), jnp.stack(b1s)   # (6,kmax,1024), (6,1,1024)
    p["gen_w2"], p["gen_b2"] = jnp.stack(w2s), jnp.stack(b2s)   # (6,1024,256), (6,1,256)
    # confidence nets
    p["confp_w"], p["confp_b"] = _dense(next(keys), 256, 1)
    p["cg_w1"], p["cg_b1"] = _dense(next(keys), 6 * 256, 6 * 256 * 2)
    p["cg_w2"], p["cg_b2"] = _dense(next(keys), 6 * 256 * 2, 6 * 256)
    p["cg_w3"], p["cg_b3"] = _dense(next(keys), 6 * 256, 1)
    # TODO(synk): ConfidNet_p (4096-patch branch) omitted; small example uses the N != 4096 branch.
    # 3 hypergraph conv layers 256 -> 256 (stacked)
    cws, cbs = [], []
    for _ in range(3):
        w, b = _dense(next(keys), 256, 256)
        cws.append(w)
        cbs.append(b)
    p["conv_w"], p["conv_b"] = jnp.stack(cws), jnp.stack(cbs)   # (3,256,256), (3,1,256)
    # attention fusion (approx. of AlignFusion): packed QKV + out proj
    wq, bq = _dense(next(keys), 256, 256)
    wk, bk = _dense(next(keys), 256, 256)
    wv, bv = _dense(next(keys), 256, 256)
    p["attn_wqkv"] = jnp.concatenate([wq, wk, wv], axis=1)      # (256, 768) bf16
    p["attn_bqkv"] = jnp.concatenate([bq, bk, bv], axis=1)      # (1, 768) f32
    p["attn_wo"], p["attn_bo"] = _dense(next(keys), 256, 256)
    # feed forward 256 -> 1024 -> 256
    p["ff_w1"], p["ff_b1"] = _dense(next(keys), 256, 1024)
    p["ff_w2"], p["ff_b2"] = _dense(next(keys), 1024, 256)
    # layer norm
    p["ln_g"] = jnp.ones((1, 256), jnp.float32)
    p["ln_b"] = jnp.zeros((1, 256), jnp.float32)
    # mm + classifier
    p["mm_w"], p["mm_b"] = _dense(next(keys), 512, 128)
    p["cls_w"], p["cls_b"] = _dense(next(keys), 128, 4)
    return p


# ----------------------------------------------------------------------------
# Forward pass
# ----------------------------------------------------------------------------
def mrepath_forward(params, x_path, x_omics, edge_index, edge_latent):
    # ---- pathomics_fc fused with ConfiNet_p_pre + mean + sigmoid (1 call) ----
    pfeat, path_tcp = pathomics_and_conf(x_path[0], params)   # (N,256), (1,1)
    num_nodes = pfeat.shape[0]

    # ---- genomics_fc: all 6 omic towers in one call (padded to max omic size) ----
    kmax = params["gen_w1"].shape[1]
    x_g = jnp.stack([jnp.pad(x_o, (0, kmax - x_o.shape[0])) for x_o in x_omics])  # (6, kmax)
    genomics_features = genomics_fc(x_g, params)               # (6, 256)

    # ---- confidence branch (computed but unused by the output, as in the reference) ----
    gene_tcp = confid_g(genomics_features.reshape(1, -1), params)   # (1, 1)
    denom = jnp.log(path_tcp * gene_tcp) + 1e-8
    path_holo = jnp.log(gene_tcp) / denom
    gene_holo = jnp.log(path_tcp) / denom
    cb_path = path_tcp + path_holo
    cb_gene = gene_tcp + gene_holo
    w_all = jax.nn.softmax(jnp.stack((cb_path, cb_gene), axis=1), axis=1)
    _w_path, _w_gene = w_all[:, 0], w_all[:, 1]                # unused downstream (matches ref)

    # ---- hypergraph construction (host glue, mirrors get_hyperedge + dhg incidence) ----
    hyper_list = get_hyperedges(np.asarray(edge_index)) + get_hyperedges(np.asarray(edge_latent))
    h_np = build_incidence(hyper_list, num_nodes)
    deg_v = h_np.sum(axis=1, keepdims=True)
    deg_e = h_np.sum(axis=0, keepdims=True).T
    dv_inv = jnp.asarray(np.where(deg_v > 0, 1.0 / np.maximum(deg_v, 1e-12), 0.0), jnp.float32)
    de_inv = jnp.asarray(np.where(deg_e > 0, 1.0 / np.maximum(deg_e, 1e-12), 0.0), jnp.float32)
    h_inc = jnp.asarray(h_np, _BF16)   # SINGLE copy of the incidence (H^T done in-kernel)

    # ---- 3 hypergraph diffusion convs fused into one call ----
    # TODO(synk): SheafBuilderGeneral / HyperDiffusionGeneralSheafConv are undefined externally;
    #             approximated here (d=1) with standard normalized hypergraph diffusion conv.
    pathomics_features = hgnn_convs3(h_inc, pfeat, params, dv_inv, de_inv)   # (N, 256)

    # ---- fused token-fusion head (attention + FFN + LN + pooling + mm + classifier) ----
    # TODO(synk): AlignFusion / FeedForward internals undefined; approximated with 4-head
    #             self-attention + residual and a 2-layer MLP + residual.
    token = jnp.concatenate([genomics_features, pathomics_features], axis=0)  # (6+N, 256)
    logits = fusion_head(token, params, n_gen_tokens=6)        # (1, 4)
    return logits


# ----------------------------------------------------------------------------
if __name__ == "__main__":
    N_PATCHES = 32                       # != 4096 -> else confidence branch
    OMIC_SIZES = [16, 24, 32, 40, 48, 56]

    params = init_params(jax.random.PRNGKey(0), OMIC_SIZES)

    keys = jax.random.split(jax.random.PRNGKey(0), 10)
    x_path = jax.random.normal(keys[0], (1, N_PATCHES, 768), jnp.float32)
    x_omics = [jax.random.normal(keys[1 + i], (OMIC_SIZES[i],), jnp.float32) for i in range(6)]
    edge_index = np.asarray(jax.random.randint(keys[7], (2, 48), 0, N_PATCHES))
    edge_latent = np.asarray(jax.random.randint(keys[8], (2, 24), 0, N_PATCHES))

    logits = mrepath_forward(params, x_path, x_omics, edge_index, edge_latent)
    logits = jax.block_until_ready(logits)
    assert logits.shape == (1, 4)
    print("KERNEL_OK")
</pallas_src>

<mosaic_0001>
module attributes {stable_mosaic.version = 11 : i64} {
  func.func @_pathomics_kernel(%arg0: memref<32x768xf32, #tpu.memory_space<vmem>>, %arg1: memref<768x256xbf16, #tpu.memory_space<vmem>>, %arg2: memref<1x256xf32, #tpu.memory_space<vmem>>, %arg3: memref<256x256xbf16, #tpu.memory_space<vmem>>, %arg4: memref<1x256xf32, #tpu.memory_space<vmem>>, %arg5: memref<256x1xbf16, #tpu.memory_space<vmem>>, %arg6: memref<1x1xf32, #tpu.memory_space<vmem>>, %arg7: memref<32x256xf32, #tpu.memory_space<vmem>>, %arg8: memref<1x1xf32, #tpu.memory_space<vmem>>) attributes {dimension_semantics = [], scalar_prefetch = 0 : i64, scratch_operands = 0 : i64, tpu.core_type = #tpu.core_type<tc>} {
    %c0 = arith.constant 0 : index
    %c0_0 = arith.constant 0 : index
    %0 = vector.load %arg0[%c0, %c0_0] : memref<32x768xf32, #tpu.memory_space<vmem>>, vector<32x768xf32>
    %1 = arith.truncf %0 : vector<32x768xf32> to vector<32x768xbf16>
    %c0_1 = arith.constant 0 : index
    %c0_2 = arith.constant 0 : index
    %2 = vector.load %arg1[%c0_1, %c0_2] : memref<768x256xbf16, #tpu.memory_space<vmem>>, vector<768x256xbf16>
    %cst = arith.constant dense<0.000000e+00> : vector<32x256xf32>
    %3 = tpu.matmul %1, %2, %cst {dimension_numbers = #tpu.dot_dimension_numbers<[1], [0], [0], [1], [0, 0, 1, 1], [], []>} : vector<32x768xbf16>, vector<768x256xbf16>, vector<32x256xf32> -> vector<32x256xf32>
    %c0_3 = arith.constant 0 : index
    %c0_4 = arith.constant 0 : index
    %4 = vector.load %arg2[%c0_3, %c0_4] : memref<1x256xf32, #tpu.memory_space<vmem>>, vector<1x256xf32>
    %5 = vector.broadcast %4 : vector<1x256xf32> to vector<32x256xf32>
    %6 = arith.addf %3, %5 : vector<32x256xf32>
    %cst_5 = arith.constant 0.000000e+00 : f32
    %cst_6 = arith.constant 6.000000e+00 : f32
    %7 = vector.broadcast %cst_5 : f32 to vector<32x256xf32>
    %8 = arith.maximumf %7, %6 : vector<32x256xf32>
    %9 = vector.broadcast %cst_6 : f32 to vector<32x256xf32>
    %10 = arith.minimumf %9, %8 : vector<32x256xf32>
    %11 = arith.truncf %10 : vector<32x256xf32> to vector<32x256xbf16>
    %c0_7 = arith.constant 0 : index
    %c0_8 = arith.constant 0 : index
    %12 = vector.load %arg3[%c0_7, %c0_8] : memref<256x256xbf16, #tpu.memory_space<vmem>>, vector<256x256xbf16>
    %cst_9 = arith.constant dense<0.000000e+00> : vector<32x256xf32>
    %13 = tpu.matmul %11, %12, %cst_9 {dimension_numbers = #tpu.dot_dimension_numbers<[1], [0], [0], [1], [0, 0, 1, 1], [], []>} : vector<32x256xbf16>, vector<256x256xbf16>, vector<32x256xf32> -> vector<32x256xf32>
    %c0_10 = arith.constant 0 : index
    %c0_11 = arith.constant 0 : index
    %14 = vector.load %arg4[%c0_10, %c0_11] : memref<1x256xf32, #tpu.memory_space<vmem>>, vector<1x256xf32>
    %15 = vector.broadcast %14 : vector<1x256xf32> to vector<32x256xf32>
    %16 = arith.addf %13, %15 : vector<32x256xf32>
    %cst_12 = arith.constant 0.000000e+00 : f32
    %cst_13 = arith.constant 6.000000e+00 : f32
    %17 = vector.broadcast %cst_12 : f32 to vector<32x256xf32>
    %18 = arith.maximumf %17, %16 : vector<32x256xf32>
    %19 = vector.broadcast %cst_13 : f32 to vector<32x256xf32>
    %20 = arith.minimumf %19, %18 : vector<32x256xf32>
    %c0_14 = arith.constant 0 : index
    %c0_15 = arith.constant 0 : index
    %21 = vector.load %arg7[%c0_14, %c0_15] : memref<32x256xf32, #tpu.memory_space<vmem>>, vector<32x256xf32>
    tpu.vector_store %arg7[%c0_14, %c0_15], %20 {strides = array<i32>} : memref<32x256xf32, #tpu.memory_space<vmem>>, vector<32x256xf32>,
    %22 = arith.truncf %20 : vector<32x256xf32> to vector<32x256xbf16>
    %c0_16 = arith.constant 0 : index
    %c0_17 = arith.constant 0 : index
    %23 = vector.load %arg5[%c0_16, %c0_17] : memref<256x1xbf16, #tpu.memory_space<vmem>>, vector<256x1xbf16>
    %cst_18 = arith.constant dense<0.000000e+00> : vector<32x1xf32>
    %24 = tpu.matmul %22, %23, %cst_18 {dimension_numbers = #tpu.dot_dimension_numbers<[1], [0], [0], [1], [0, 0, 1, 1], [], []>} : vector<32x256xbf16>, vector<256x1xbf16>, vector<32x1xf32> -> vector<32x1xf32>
    %c0_19 = arith.constant 0 : index
    %c0_20 = arith.constant 0 : index
    %25 = vector.load %arg6[%c0_19, %c0_20] : memref<1x1xf32, #tpu.memory_space<vmem>>, vector<1x1xf32>
    %26 = vector.broadcast %25 : vector<1x1xf32> to vector<32x1xf32>
    %27 = arith.addf %24, %26 : vector<32x1xf32>
    %cst_21 = arith.constant dense<0.000000e+00> : vector<1xf32>
    %28 = vector.multi_reduction <add>, %27, %cst_21 [0] : vector<32x1xf32> to vector<1xf32>
    %29 = vector.shape_cast %28 : vector<1xf32> to vector<1x1xf32>
    %cst_22 = arith.constant 3.200000e+01 : f32
    %30 = vector.broadcast %cst_22 : f32 to vector<1x1xf32>
    %31 = arith.divf %29, %30 : vector<1x1xf32>
    %32 = arith.negf %31 : vector<1x1xf32>
    %33 = math.exp %32 : vector<1x1xf32>
    %cst_23 = arith.constant 1.000000e+00 : f32
    %34 = vector.broadcast %cst_23 : f32 to vector<1x1xf32>
    %35 = arith.addf %34, %33 : vector<1x1xf32>
    %36 = arith.divf %34, %35 : vector<1x1xf32>
    %c0_24 = arith.constant 0 : index
    %c0_25 = arith.constant 0 : index
    %37 = vector.load %arg8[%c0_24, %c0_25] : memref<1x1xf32, #tpu.memory_space<vmem>>, vector<1x1xf32>
    tpu.vector_store %arg8[%c0_24, %c0_25], %36 {strides = array<i32>} : memref<1x1xf32, #tpu.memory_space<vmem>>, vector<1x1xf32>,
    return
  }
}

</mosaic_0001>

<bundles_post_ra>
// kernel: tpu_custom_call.1
= control target key start
LH: loop header
LB: loop body
LE: loop exit
PB: predicated region body
PF: predicated region fallthrough
CT: control target
= control target key end

     0   :  { %s2184_s0 = inlined_call_operand.hbm [shape: f32[32,768], index: 0, kind: input, shape index: {}]   ;;  %s2185_s1 = inlined_call_operand.hbm [shape: bf16[768,256], index: 1, kind: input, shape index: {}]   ;;  %s2186_s2 = inlined_call_operand.vmem [shape: f32[1,256], index: 2, kind: input, shape index: {}]   ;;  %s2187_s3 = inlined_call_operand.hbm [shape: bf16[256,256], index: 3, kind: input, shape index: {}]   ;;  %s2188_s4 = inlined_call_operand.vmem [shape: f32[1,256], index: 4, kind: input, shape index: {}]   ;;  %s2189_s5 = inlined_call_operand.vmem [shape: bf16[256,1], index: 5, kind: input, shape index: {}]   ;;  %s2190_s6 = inlined_call_operand.<no memory space> [shape: f32[1,1], index: 6, kind: input, shape index: {}]   ;;  %s2191_s7 = inlined_call_operand.hbm [shape: f32[32,256], index: 7, kind: output, shape index: {0}]   ;;  %s2192_s8 = inlined_call_operand.hbm [shape: f32[1,1], index: 8, kind: output, shape index: {1}]  }
   0x1   :  { %v14_v0 = vstv %s2190_s6 }
   0x2   :  { %15 = vst [vmem:[#allocation2] sm:$0x1] %v14_v0 }
   0x3   :  { %16 = vsyncpa [#allocation4], 0 }
   0x4   :  { %17 = vsyncpa [#allocation7], 0 }
   0x5   :  { %18 = vsyncpa [#allocation5], 0 }
   0x6   :  { %19 = vsyncpa [#allocation11], 0  ;;  %s1957_s29 = smov [#allocation6]   ;;  %s1839_s11 = scalar_lea.hbm %s2185_s1, 12288 }
   0x7   :  { %s37_s30 = sshll.u32 %s1957_s29, 4  ;;  %p1840_p0 = scmp.ne.s32.totalorder %s2185_s1, %s1839_s11  ;;  %s38_s30 = int_to_ptr.vmem [resolvable:$true] %s37_s30 }
   0x8   :  { %p1843_p1 = scmp.lt.u32.totalorder %s1839_s11, %s2185_s1 }
   0xa   :  { %p1845_p2 = pnand %p1843_p1, %p1840_p0 }
   0xc   :  { %1848 = shalt.err (!%p1845_p2)
}
   0xd   :  { %s1849_s6 = scalar_lea.vmem %s38_s30, 12288  ;;  %p1854_p4 = scmp.lt.s32.totalorder %s38_s30, %s38_s30 }
   0xe   :  { %p1850_p3 = scmp.ne.s32.totalorder %s38_s30, %s1849_s6  ;;  %p1855_p5 = scmp.lt.s32.totalorder %s1849_s6, %s1849_s6 }
  0x10   :  { %p1856_p6 = por %p1855_p5, %p1854_p4 }
  0x12   :  { %p1857_p7 = pnand %p1856_p6, %p1850_p3 }
  0x14   :  { %1860 = shalt.err (!%p1857_p7)
}
  0x15   :  { %s1958_s16 = smov 128   ;;  %s1959_s17 = smov 8  }
  0x16   :  { %43 = dma.hbm_to_vmem [thread:$0]  %s2185_s1, 12288, %s38_s30, [#allocation7], %s1958_s16, %s1958_s16, %s1959_s17  }
  0x17   :  { %s1960_s20 = smov [#allocation3]   ;;  %s1861_s24 = scalar_lea.hbm %s2184_s0, 3072 }
  0x18   :  { %s25_s21 = sshll.u32 %s1960_s20, 4  ;;  %p1862_p8 = scmp.ne.s32.totalorder %s2184_s0, %s1861_s24  ;;  %s26_s21 = int_to_ptr.vmem [resolvable:$true] %s25_s21 }
  0x19   :  { %p1865_p9 = scmp.lt.u32.totalorder %s1861_s24, %s2184_s0 }
  0x1b   :  { %p1867_p10 = pnand %p1865_p9, %p1862_p8 }
  0x1d   :  { %1870 = shalt.err (!%p1867_p10)
}
  0x1e   :  { %s1871_s29 = scalar_lea.vmem %s26_s21, 3072  ;;  %p1876_p12 = scmp.lt.s32.totalorder %s26_s21, %s26_s21 }
  0x1f   :  { %p1872_p11 = scmp.ne.s32.totalorder %s26_s21, %s1871_s29  ;;  %p1877_p13 = scmp.lt.s32.totalorder %s1871_s29, %s1871_s29 }
  0x21   :  { %p1878_p0 = por %p1877_p13, %p1876_p12 }
  0x23   :  { %p1879_p1 = pnand %p1878_p0, %p1872_p11 }
  0x25   :  { %1882 = shalt.err (!%p1879_p1)
}
  0x26   :  { %s1961_s1 = smov 768   ;;  %s1962_s30 = smov 48  }
  0x27   :  { %31 = dma.hbm_to_vmem [thread:$0]  %s2184_s0, 3072, %s26_s21, [#allocation4], %s1961_s1, %s1961_s1, %s1962_s30  }
  0x28   :  { %s1963_s11 = smov [#allocation8]   ;;  %s1883_s15 = scalar_lea.hbm %s2187_s3, 4096 }
  0x29   :  { %s51_s12 = sshll.u32 %s1963_s11, 4  ;;  %p1884_p2 = scmp.ne.s32.totalorder %s2187_s3, %s1883_s15  ;;  %s52_s12 = int_to_ptr.vmem [resolvable:$true] %s51_s12 }
  0x2a   :  { %p1887_p3 = scmp.lt.u32.totalorder %s1883_s15, %s2187_s3 }
  0x2c   :  { %p1889_p4 = pnand %p1887_p3, %p1884_p2 }
  0x2e   :  { %1892 = shalt.err (!%p1889_p4)
}
  0x2f   :  { %s1893_s22 = scalar_lea.vmem %s52_s12, 4096  ;;  %p1898_p6 = scmp.lt.s32.totalorder %s52_s12, %s52_s12 }
  0x30   :  { %p1894_p5 = scmp.ne.s32.totalorder %s52_s12, %s1893_s22  ;;  %p1899_p7 = scmp.lt.s32.totalorder %s1893_s22, %s1893_s22 }
  0x32   :  { %p1900_p8 = por %p1899_p7, %p1898_p6 }
  0x34   :  { %p1901_p9 = pnand %p1900_p8, %p1894_p5 }
  0x36   :  { %1904 = shalt.err (!%p1901_p9)
}
  0x37   :  { %57 = dma.hbm_to_vmem [thread:$0]  %s2187_s3, 4096, %s52_s12, [#allocation7], %s1958_s16, %s1958_s16, %s1959_s17  }
  0x38   :  { %1949 = dma.done.wait [#allocation4], 3072  }
  0x39   :  { %1950 = vsyncadd [#allocation4], 4294964224 }
  0x3a   :  { %1951 = dma.done.wait [#allocation7], 16384  }
  0x3b   :  { %1952 = vsyncadd [#allocation7], 4294950912  ;;  %v1627_v1 = vld [vmem:[#allocation6 + $0x104] ss:$8 sps:$4 sm:$0xff]   ;;  %v1629_v2 = vld [vmem:[#allocation6 + $0x100] ss:$8 sps:$4 sm:$0xff]  }
  0x3c   :  { %751 = vmatprep.subr.bf16.mxu0 %v1627_v1  ;;  %v1630_v3 = vld [vmem:[#allocation6 + $0x114] ss:$8 sps:$4 sm:$0xff]   ;;  %v1632_v4 = vld [vmem:[#allocation6 + $0x110] ss:$8 sps:$4 sm:$0xff]   ;;  %v1633_v5 = vld [vmem:[#allocation6 + $0x124] ss:$8 sps:$4 sm:$0xff]  }
  0x3d   :  { %752 = vmatpush1.bf16.msra.mxu0 %v1629_v2  ;;  %v1635_v6 = vld [vmem:[#allocation6 + $0x120] ss:$8 sps:$4 sm:$0xff]   ;;  %v1636_v7 = vld [vmem:[#allocation6 + $0x134] ss:$8 sps:$4 sm:$0xff]   ;;  %v1638_v8 = vld [vmem:[#allocation6 + $0x130] ss:$8 sps:$4 sm:$0xff]  }
  0x3e   :  { %753 = vmatprep.subr.bf16.mxu0 %v1630_v3  ;;  %v1639_v9 = vld [vmem:[#allocation6 + $0x144] ss:$8 sps:$4 sm:$0xff]   ;;  %v1641_v10 = vld [vmem:[#allocation6 + $0x140] ss:$8 sps:$4 sm:$0xff]   ;;  %v1642_v11 = vld [vmem:[#allocation6 + $0x154] ss:$8 sps:$4 sm:$0xff]  }
  0x3f   :  { %v1644_v12 = vld [vmem:[#allocation6 + $0x150] ss:$8 sps:$4 sm:$0xff]   ;;  %v1645_v13 = vld [vmem:[#allocation6 + $0x164] ss:$8 sps:$4 sm:$0xff]   ;;  %v1674_v15 = vld [vmem:[#allocation6] ss:$8 sps:$4 sm:$0xff]  }
  0x40   :  { %v1672_v14 = vld [vmem:[#allocation6 + $0x4] ss:$8 sps:$4 sm:$0xff]   ;;  %v1647_v16 = vld [vmem:[#allocation6 + $0x160] ss:$8 sps:$4 sm:$0xff]   ;;  %v1648_v17 = vld [vmem:[#allocation6 + $0x174] ss:$8 sps:$4 sm:$0xff]  }
  0x41   :  { %754 = vmatpush1.bf16.msra.mxu0 %v1632_v4  ;;  %698 = vmatprep.subr.bf16.mxu1 %v1672_v14  ;;  %v1678_v18 = vld [vmem:[#allocation6 + $0x14] ss:$8 sps:$4 sm:$0xff]   ;;  %v1680_v19 = vld [vmem:[#allocation6 + $0x10] ss:$8 sps:$4 sm:$0xff]   ;;  %v83_v21 = vld [vmem:[#allocation3 + $0x48] sm:$0xff] }
  0x42   :  { %755 = vmatprep.subr.bf16.mxu0 %v1633_v5  ;;  %699 = vmatpush1.bf16.msra.mxu1 %v1674_v15  ;;  %v77_v20 = vld [vmem:[#allocation3 + $0x18] sm:$0xff]  ;;  %v1684_v24 = vld [vmem:[#allocation6 + $0x24] ss:$8 sps:$4 sm:$0xff]   ;;  %v1686_v25 = vld [vmem:[#allocation6 + $0x20] ss:$8 sps:$4 sm:$0xff]  }
  0x43   :  { %700 = vmatprep.subr.bf16.mxu1 %v1678_v18  ;;  %v101_v22 = vpack.c.bf16 %v83_v21, %v77_v20  ;;  %v1650_v23 = vld [vmem:[#allocation6 + $0x170] ss:$8 sps:$4 sm:$0xff]   ;;  %v1651_v26 = vld [vmem:[#allocation6 + $0x184] ss:$8 sps:$4 sm:$0xff]   ;;  %v1653_v27 = vld [vmem:[#allocation6 + $0x180] ss:$8 sps:$4 sm:$0xff]  }
  0x44   :  { %v1690_v28 = vld [vmem:[#allocation6 + $0x34] ss:$8 sps:$4 sm:$0xff]   ;;  %v1692_v30 = vld [vmem:[#allocation6 + $0x30] ss:$8 sps:$4 sm:$0xff]   ;;  %v1696_v31 = vld [vmem:[#allocation6 + $0x44] ss:$8 sps:$4 sm:$0xff]  }
  0x45   :  { %756 = vmatpush1.bf16.msra.mxu0 %v1635_v6  ;;  %783 = vmatprep.mubr.bf16.mxu0 %v101_v22  ;;  %v1654_v29 = vld [vmem:[#allocation6 + $0x194] ss:$8 sps:$4 sm:$0xff]   ;;  %v1656_v32 = vld [vmem:[#allocation6 + $0x190] ss:$8 sps:$4 sm:$0xff]   ;;  %v1657_v33 = vld [vmem:[#allocation6 + $0x1a4] ss:$8 sps:$4 sm:$0xff]  }
  0x46   :  { %757 = vmatprep.subr.bf16.mxu0 %v1636_v7  ;;  %701 = vmatpush1.bf16.msra.mxu1 %v1680_v19  ;;  %v1698_v34 = vld [vmem:[#allocation6 + $0x40] ss:$8 sps:$4 sm:$0xff]   ;;  %v1702_v35 = vld [vmem:[#allocation6 + $0x54] ss:$8 sps:$4 sm:$0xff]   ;;  %v1704_v38 = vld [vmem:[#allocation6 + $0x50] ss:$8 sps:$4 sm:$0xff]  }
  0x47   :  { %702 = vmatprep.subr.bf16.mxu1 %v1684_v24  ;;  %v1659_v36 = vld [vmem:[#allocation6 + $0x1a0] ss:$8 sps:$4 sm:$0xff]   ;;  %v1660_v37 = vld [vmem:[#allocation6 + $0x1b4] ss:$8 sps:$4 sm:$0xff]   ;;  %v1708_v39 = vld [vmem:[#allocation6 + $0x64] ss:$8 sps:$4 sm:$0xff]  }
  0x48   :  { %v1662_v40 = vld [vmem:[#allocation6 + $0x1b0] ss:$8 sps:$4 sm:$0xff]   ;;  %v1663_v41 = vld [vmem:[#allocation6 + $0x1c4] ss:$8 sps:$4 sm:$0xff]   ;;  %v1710_v42 = vld [vmem:[#allocation6 + $0x60] ss:$8 sps:$4 sm:$0xff]  }
  0x49   :  { %758 = vmatpush1.bf16.msra.mxu0 %v1638_v8  ;;  %v1714_v43 = vld [vmem:[#allocation6 + $0x74] ss:$8 sps:$4 sm:$0xff]   ;;  %v1665_v44 = vld [vmem:[#allocation6 + $0x1c0] ss:$8 sps:$4 sm:$0xff]   ;;  %v1716_v46 = vld [vmem:[#allocation6 + $0x70] ss:$8 sps:$4 sm:$0xff]  }
  0x4a   :  { %759 = vmatprep.subr.bf16.mxu0 %v1639_v9  ;;  %703 = vmatpush1.bf16.msra.mxu1 %v1686_v25  ;;  %v1666_v45 = vld [vmem:[#allocation6 + $0x1d4] ss:$8 sps:$4 sm:$0xff]   ;;  %v1720_v47 = vld [vmem:[#allocation6 + $0x84] ss:$8 sps:$4 sm:$0xff]   ;;  %v1668_v48 = vld [vmem:[#allocation6 + $0x1d0] ss:$8 sps:$4 sm:$0xff]  }
  0x4b   :  { %704 = vmatprep.subr.bf16.mxu1 %v1690_v28  ;;  %v1669_v49 = vld [vmem:[#allocation6 + $0x1e4] ss:$8 sps:$4 sm:$0xff]   ;;  %v1722_v50 = vld [vmem:[#allocation6 + $0x80] ss:$8 sps:$4 sm:$0xff]   ;;  %v1726_v51 = vld [vmem:[#allocation6 + $0x94] ss:$8 sps:$4 sm:$0xff]  }
  0x4c   :  { %v1671_v52 = vld [vmem:[#allocation6 + $0x1e0] ss:$8 sps:$4 sm:$0xff]   ;;  %v1675_v53 = vld [vmem:[#allocation6 + $0x1f4] ss:$8 sps:$4 sm:$0xff]   ;;  %v1728_v54 = vld [vmem:[#allocation6 + $0x90] ss:$8 sps:$4 sm:$0xff]  }
  0x4d   :  { %760 = vmatpush1.bf16.msra.mxu0 %v1641_v10  ;;  %v1732_v55 = vld [vmem:[#allocation6 + $0xa4] ss:$8 sps:$4 sm:$0xff]   ;;  %v1677_v56 = vld [vmem:[#allocation6 + $0x1f0] ss:$8 sps:$4 sm:$0xff]   ;;  %v1734_v60 = vld [vmem:[#allocation6 + $0xa0] ss:$8 sps:$4 sm:$0xff]  }
  0x4e   :  { %761 = vmatprep.subr.bf16.mxu0 %v1642_v11  ;;  %705 = vmatpush1.bf16.msra.mxu1 %v1692_v30  ;;  %v1683_v57 = vld [vmem:[#allocation6 + $0x204] ss:$8 sps:$4 sm:$0xff]   ;;  %v76_v58 = vld [vmem:[#allocation3 + $0x10] sm:$0xff]  ;;  %v89_v63 = vld [vmem:[#allocation3 + $0x78] sm:$0xff] }
  0x4f   :  { %706 = vmatprep.subr.bf16.mxu1 %v1696_v31  ;;  %v82_v59 = vld [vmem:[#allocation3 + $0x40] sm:$0xff]  ;;  %v1738_v61 = vld [vmem:[#allocation6 + $0xb4] ss:$8 sps:$4 sm:$0xff]   ;;  %v95_v0 = vld [vmem:[#allocation3 + $0xa8] sm:$0xff] }
  0x50   :  { %v100_v62 = vpack.c.bf16 %v82_v59, %v76_v58  ;;  %v1681_v1 = vld [vmem:[#allocation6 + $0x200] ss:$8 sps:$4 sm:$0xff]   ;;  %v1689_v2 = vld [vmem:[#allocation6 + $0x214] ss:$8 sps:$4 sm:$0xff]   ;;  %v1740_v3 = vld [vmem:[#allocation6 + $0xb0] ss:$8 sps:$4 sm:$0xff]   ;;  %v107_v5 = vpack.c.bf16 %v95_v0, %v89_v63 }
  0x51   :  { %762 = vmatpush1.bf16.msra.mxu0 %v1644_v12  ;;  %v1744_v4 = vld [vmem:[#allocation6 + $0xc4] ss:$8 sps:$4 sm:$0xff]   ;;  %v81_v7 = vld [vmem:[#allocation3 + $0x38] sm:$0xff]  ;;  %v1746_v9 = vld [vmem:[#allocation6 + $0xc0] ss:$8 sps:$4 sm:$0xff]  }
  0x52   :  { %763 = vmatprep.subr.bf16.mxu0 %v1645_v13  ;;  %707 = vmatpush1.bf16.msra.mxu1 %v1698_v34  ;;  %v75_v6 = vld [vmem:[#allocation3 + $0x8] sm:$0xff]  ;;  %v1687_v8 = vld [vmem:[#allocation6 + $0x210] ss:$8 sps:$4 sm:$0xff]   ;;  %v94_v12 = vld [vmem:[#allocation3 + $0xa0] sm:$0xff] }
  0x53   :  { %708 = vmatprep.subr.bf16.mxu1 %v1702_v35  ;;  %v99_v10 = vpack.c.bf16 %v81_v7, %v75_v6  ;;  %v88_v11 = vld [vmem:[#allocation3 + $0x70] sm:$0xff]  ;;  %v1695_v13 = vld [vmem:[#allocation6 + $0x224] ss:$8 sps:$4 sm:$0xff]   ;;  %v1693_v18 = vld [vmem:[#allocation6 + $0x220] ss:$8 sps:$4 sm:$0xff]  }
  0x54   :  { %v1750_v14 = vld [vmem:[#allocation6 + $0xd4] ss:$8 sps:$4 sm:$0xff]   ;;  %v106_v15 = vpack.c.bf16 %v94_v12, %v88_v11  ;;  %v1752_v20 = vld [vmem:[#allocation6 + $0xd0] ss:$8 sps:$4 sm:$0xff]   ;;  %v1756_v21 = vld [vmem:[#allocation6 + $0xe4] ss:$8 sps:$4 sm:$0xff]  }
  0x55   :  { %764 = vmatpush1.bf16.msra.mxu0 %v1647_v16  ;;  %730 = vmatprep.mubr.bf16.mxu1 %v99_v10  ;;  %v79_v16 = vld [vmem:[#allocation3 + $0x28] sm:$0xff]  ;;  %v1701_v19 = vld [vmem:[#allocation6 + $0x234] ss:$8 sps:$4 sm:$0xff]   ;;  %v1764_v28 = vld [vmem:[#allocation6 + $0xf0] ss:$8 sps:$4 sm:$0xff]  }
  0x56   :  { %765 = vmatprep.subr.bf16.mxu0 %v1648_v17  ;;  %709 = vmatpush1.bf16.msra.mxu1 %v1704_v38  ;;  %v85_v17 = vld [vmem:[#allocation3 + $0x58] sm:$0xff]  ;;  %v1707_v24 = vld [vmem:[#allocation6 + $0x244] ss:$8 sps:$4 sm:$0xff]   ;;  %v1758_v25 = vld [vmem:[#allocation6 + $0xe0] ss:$8 sps:$4 sm:$0xff]  }
  0x57   :  { %710 = vmatprep.subr.bf16.mxu1 %v1708_v39  ;;  %v103_v22 = vpack.c.bf16 %v85_v17, %v79_v16  ;;  %v74_v30 = vld [vmem:[#allocation3] sm:$0xff]  ;;  %v80_v31 = vld [vmem:[#allocation3 + $0x30] sm:$0xff] }
  0x58   :  { %v1773_v34 = vld [vmem:[#allocation8 + $0x4] ss:$8 sps:$4 sm:$0xff]   ;;  %v98_v35 = vpack.c.bf16 %v80_v31, %v74_v30  ;;  %v1771_v39 = vld [vmem:[#allocation8] ss:$8 sps:$4 sm:$0xff]   ;;  %v1788_v59 = vld [vmem:[#allocation8 + $0x54] ss:$8 sps:$4 sm:$0xff]  }
  0x59   :  { %766 = vmatpush1.bf16.msra.mxu0 %v1650_v23  ;;  %v1699_v23 = vld [vmem:[#allocation6 + $0x230] ss:$8 sps:$4 sm:$0xff]   ;;  %v1783_v58 = vld [vmem:[#allocation8 + $0x40] ss:$8 sps:$4 sm:$0xff]   ;;  %v1791_v63 = vld [vmem:[#allocation8 + $0x64] ss:$8 sps:$4 sm:$0xff]  }
  0x5a   :  { %767 = vmatprep.subr.bf16.mxu0 %v1651_v26  ;;  %711 = vmatpush1.bf16.msra.mxu1 %v1710_v42  ;;  %v1762_v26 = vld [vmem:[#allocation6 + $0xf4] ss:$8 sps:$4 sm:$0xff]   ;;  %v1747_v0 = vld [vmem:[#allocation6 + $0x2b0] ss:$8 sps:$4 sm:$0xff]   ;;  %v1797_v7 = vld [vmem:[#allocation8 + $0x84] ss:$8 sps:$4 sm:$0xff]  }
  0x5b   :  { %712 = vmatprep.subr.bf16.mxu1 %v1714_v43  ;;  %v1725_v42 = vld [vmem:[#allocation6 + $0x274] ss:$8 sps:$4 sm:$0xff]   ;;  %v86_v43 = vld [vmem:[#allocation3 + $0x60] sm:$0xff]  ;;  %v1792_v6 = vld [vmem:[#allocation8 + $0x70] ss:$8 sps:$4 sm:$0xff]  }
  0x5c   :  { %v1795_v10 = vld [vmem:[#allocation8 + $0x80] ss:$8 sps:$4 sm:$0xff]   ;;  %v1800_v11 = vld [vmem:[#allocation8 + $0x94] ss:$8 sps:$4 sm:$0xff]   ;;  %v1768_v16 = vld [vmem:[#allocation6 + $0x2f0] ss:$8 sps:$4 sm:$0xff]  }
  0x5d   :  { %768 = vmatpush1.bf16.msra.mxu0 %v1653_v27  ;;  %v1705_v27 = vld [vmem:[#allocation6 + $0x240] ss:$8 sps:$4 sm:$0xff]   ;;  %v1809_v30 = vld [vmem:[#allocation8 + $0xc4] ss:$8 sps:$4 sm:$0xff]   ;;  %v1812_v31 = vld [vmem:[#allocation8 + $0xd4] ss:$8 sps:$4 sm:$0xff]  }
  0x5e   :  { %769 = vmatprep.subr.bf16.mxu0 %v1654_v29  ;;  %713 = vmatpush1.bf16.msra.mxu1 %v1716_v46  ;;  %v1713_v29 = vld [vmem:[#allocation6 + $0x254] ss:$8 sps:$4 sm:$0xff]   ;;  %v1779_v46 = vld [vmem:[#allocation8 + $0x24] ss:$8 sps:$4 sm:$0xff]   ;;  %v1765_v12 = vld [vmem:[#allocation6 + $0x2e0] ss:$8 sps:$4 sm:$0xff]  }
  0x5f   :  { %714 = vmatprep.subr.bf16.mxu1 %v1720_v47  ;;  %v1723_v47 = vld [vmem:[#allocation6 + $0x270] ss:$8 sps:$4 sm:$0xff]   ;;  %v78_v17 = vld [vmem:[#allocation3 + $0x20] sm:$0xff] }
  0x61   :  { %770 = vmatpush1.bf16.msra.mxu0 %v1656_v32  ;;  %v87_v32 = vld [vmem:[#allocation3 + $0x68] sm:$0xff] }
  0x62   :  { %771 = vmatprep.subr.bf16.mxu0 %v1657_v33  ;;  %715 = vmatpush1.bf16.msra.mxu1 %v1722_v50  ;;  %v93_v33 = vld [vmem:[#allocation3 + $0x98] sm:$0xff]  ;;  %v1777_v50 = vld [vmem:[#allocation8 + $0x20] ss:$8 sps:$4 sm:$0xff]  }
  0x63   :  { %716 = vmatprep.subr.bf16.mxu1 %v1726_v51  ;;  %v105_v38 = vpack.c.bf16 %v93_v33, %v87_v32  ;;  %v1782_v51 = vld [vmem:[#allocation8 + $0x34] ss:$8 sps:$4 sm:$0xff]   ;;  %v1810_v32 = vld [vmem:[#allocation8 + $0xd0] ss:$8 sps:$4 sm:$0xff]   ;;  %v1815_v33 = vld [vmem:[#allocation8 + $0xe4] ss:$8 sps:$4 sm:$0xff]  }
  0x65   :  { %772 = vmatpush1.bf16.msra.mxu0 %v1659_v36  ;;  %v1711_v36 = vld [vmem:[#allocation6 + $0x250] ss:$8 sps:$4 sm:$0xff]  }
  0x66   :  { %773 = vmatprep.subr.bf16.mxu0 %v1660_v37  ;;  %717 = vmatpush1.bf16.msra.mxu1 %v1728_v54  ;;  %v1719_v37 = vld [vmem:[#allocation6 + $0x264] ss:$8 sps:$4 sm:$0xff]   ;;  %v1780_v54 = vld [vmem:[#allocation8 + $0x30] ss:$8 sps:$4 sm:$0xff]  }
  0x67   :  { %718 = vmatprep.subr.bf16.mxu1 %v1732_v55  ;;  %v1785_v55 = vld [vmem:[#allocation8 + $0x44] ss:$8 sps:$4 sm:$0xff]  }
  0x69   :  { %774 = vmatpush1.bf16.msra.mxu0 %v1662_v40  ;;  %v1717_v40 = vld [vmem:[#allocation6 + $0x260] ss:$8 sps:$4 sm:$0xff]  }
  0x6a   :  { %775 = vmatprep.subr.bf16.mxu0 %v1663_v41  ;;  %719 = vmatpush1.bf16.msra.mxu1 %v1734_v60  ;;  %v1776_v41 = vld [vmem:[#allocation8 + $0x14] ss:$8 sps:$4 sm:$0xff]   ;;  %v1741_v60 = vld [vmem:[#allocation6 + $0x2a0] ss:$8 sps:$4 sm:$0xff]  }
  0x6b   :  { %720 = vmatprep.subr.bf16.mxu1 %v1738_v61  ;;  %v1749_v61 = vld [vmem:[#allocation6 + $0x2b4] ss:$8 sps:$4 sm:$0xff]  }
  0x6d   :  { %776 = vmatpush1.bf16.msra.mxu0 %v1665_v44  ;;  %v92_v44 = vld [vmem:[#allocation3 + $0x90] sm:$0xff] }
  0x6e   :  { %777 = vmatprep.subr.bf16.mxu0 %v1666_v45  ;;  %721 = vmatpush1.bf16.msra.mxu1 %v1740_v3  ;;  %v1774_v45 = vld [vmem:[#allocation8 + $0x10] ss:$8 sps:$4 sm:$0xff]   ;;  %v1794_v3 = vld [vmem:[#allocation8 + $0x74] ss:$8 sps:$4 sm:$0xff]  }
  0x6f   :  { %722 = vmatprep.subr.bf16.mxu1 %v1744_v4  ;;  %v1753_v4 = vld [vmem:[#allocation6 + $0x2c0] ss:$8 sps:$4 sm:$0xff]  }
  0x71   :  { %778 = vmatpush1.bf16.msra.mxu0 %v1668_v48  ;;  %v1731_v48 = vld [vmem:[#allocation6 + $0x284] ss:$8 sps:$4 sm:$0xff]  }
  0x72   :  { %779 = vmatprep.subr.bf16.mxu0 %v1669_v49  ;;  %723 = vmatpush1.bf16.msra.mxu1 %v1746_v9  ;;  %v104_v49 = vpack.c.bf16 %v92_v44, %v86_v43  ;;  %v1767_v9 = vld [vmem:[#allocation6 + $0x2e4] ss:$8 sps:$4 sm:$0xff]   ;;  %v2093_v43 = vld [vmem:[%s2189_s5 + $0x58] sm:$0xff]  }
  0x73   :  { %724 = vmatprep.subr.bf16.mxu1 %v1750_v14  ;;  %v1798_v14 = vld [vmem:[#allocation8 + $0x90] ss:$8 sps:$4 sm:$0xff]  }
  0x74   :  { %v2099_v44 = vld [vmem:[%s2189_s5 + $0x18] sm:$0xff]  }
  0x75   :  { %780 = vmatpush1.bf16.msra.mxu0 %v1671_v52  ;;  %v1729_v52 = vld [vmem:[#allocation6 + $0x280] ss:$8 sps:$4 sm:$0xff]  }
  0x76   :  { %781 = vmatprep.subr.bf16.mxu0 %v1675_v53  ;;  %725 = vmatpush1.bf16.msra.mxu1 %v1752_v20  ;;  %v1737_v53 = vld [vmem:[#allocation6 + $0x294] ss:$8 sps:$4 sm:$0xff]  }
  0x77   :  { %726 = vmatprep.subr.bf16.mxu1 %v1756_v21  ;;  %v97_v20 = vld [vmem:[#allocation3 + $0xb8] sm:$0xff]  ;;  %v1801_v21 = vld [vmem:[#allocation8 + $0xa0] ss:$8 sps:$4 sm:$0xff]  }
  0x79   :  { %782 = vmatpush1.bf16.msra.mxu0 %v1677_v56  ;;  %v1735_v56 = vld [vmem:[#allocation6 + $0x290] ss:$8 sps:$4 sm:$0xff]  }
  0x7a   :  { %804 = vmatprep.subr.bf16.mxu0 %v1683_v57  ;;  %727 = vmatpush1.bf16.msra.mxu1 %v1758_v25  ;;  %v1743_v57 = vld [vmem:[#allocation6 + $0x2a4] ss:$8 sps:$4 sm:$0xff]   ;;  %v1804_v25 = vld [vmem:[#allocation8 + $0xb0] ss:$8 sps:$4 sm:$0xff]  }
  0x7b   :  { %728 = vmatprep.subr.bf16.mxu1 %v1762_v26  ;;  %v90_v26 = vld [vmem:[#allocation3 + $0x80] sm:$0xff] }
  0x7c   :  { %784 = vmatmul.mubr.bf16.vlgmr.msra.gmra.mrb[0].mxu0 %v100_v62  ;;  %v1786_v62 = vld [vmem:[#allocation8 + $0x50] ss:$8 sps:$4 sm:$0xff]  }
  0x7d   :  { %805 = vmatpush1.bf16.msra.mxu0 %v1681_v1  ;;  %793 = vmatprep.mubr.bf16.mxu0 %v107_v5  ;;  %v1755_v1 = vld [vmem:[#allocation6 + $0x2c4] ss:$8 sps:$4 sm:$0xff]   ;;  %v1761_v5 = vld [vmem:[#allocation6 + $0x2d4] ss:$8 sps:$4 sm:$0xff]  }
  0x7e   :  { %806 = vmatprep.subr.bf16.mxu0 %v1689_v2  ;;  %729 = vmatpush1.bf16.msra.mxu1 %v1764_v28  ;;  %v1789_v2 = vld [vmem:[#allocation8 + $0x60] ss:$8 sps:$4 sm:$0xff]  }
  0x7f   :  { %1081 = vmatprep.subr.bf16.mxu1 %v1773_v34  ;;  %v1813_v34 = vld [vmem:[#allocation8 + $0xe0] ss:$8 sps:$4 sm:$0xff]  }
  0x81   :  { %807 = vmatpush1.bf16.msra.mxu0 %v1687_v8  ;;  %731 = vmatmul.mubr.bf16.vlgmr.msra.gmra.mrb[0].mxu1 %v98_v35  ;;  %v1759_v8 = vld [vmem:[#allocation6 + $0x2d0] ss:$8 sps:$4 sm:$0xff]   ;;  %v1818_v35 = vld [vmem:[#allocation8 + $0xf4] ss:$8 sps:$4 sm:$0xff]  }
  0x82   :  { %808 = vmatprep.subr.bf16.mxu0 %v1695_v13  ;;  %740 = vmatprep.mubr.bf16.mxu1 %v105_v38  ;;  %v1770_v13 = vld [vmem:[#allocation6 + $0x2f4] ss:$8 sps:$4 sm:$0xff]  }
  0x83   :  { %1082 = vmatpush1.bf16.msra.mxu1 %v1771_v39  ;;  %v2064_v38 = vld [vmem:[%s2189_s5] sm:$0xff]   ;;  %v2069_v39 = vld [vmem:[%s2189_s5 + $0x48] sm:$0xff]  }
  0x84   :  { %794 = vmatmul.mubr.bf16.gmra.mrb[4].mxu0 %v106_v15  ;;  %1083 = vmatprep.subr.bf16.mxu1 %v1776_v41  ;;  %v1803_v15 = vld [vmem:[#allocation8 + $0xa4] ss:$8 sps:$4 sm:$0xff]  }
  0x85   :  { %809 = vmatpush1.bf16.msra.mxu0 %v1693_v18  ;;  %836 = vmatprep.mubr.bf16.mxu0 %v103_v22  ;;  %v84_v18 = vld [vmem:[#allocation3 + $0x50] sm:$0xff] }
  0x86   :  { %810 = vmatprep.subr.bf16.mxu0 %v1701_v19  ;;  %v91_v19 = vld [vmem:[#allocation3 + $0x88] sm:$0xff]  ;;  %v1806_v22 = vld [vmem:[#allocation8 + $0xb4] ss:$8 sps:$4 sm:$0xff]  }
  0x87   :  { %1084 = vmatpush1.bf16.msra.mxu1 %v1774_v45  ;;  %v2081_v41 = vld [vmem:[%s2189_s5 + $0x50] sm:$0xff]   ;;  %v2105_v45 = vld [vmem:[%s2189_s5 + $0x60] sm:$0xff]  }
  0x88   :  { %1085 = vmatprep.subr.bf16.mxu1 %v1779_v46  ;;  %v2111_v46 = vld [vmem:[%s2189_s5 + $0x20] sm:$0xff]  }
  0x89   :  { %811 = vmatpush1.bf16.msra.mxu0 %v1699_v23  ;;  %741 = vmatmul.mubr.bf16.gmra.mrb[4].mxu1 %v104_v49  ;;  %v102_v23 = vpack.c.bf16 %v84_v18, %v78_v17 }
  0x8a   :  { %812 = vmatprep.subr.bf16.mxu0 %v1707_v24  ;;  %v109_v24 = vpack.c.bf16 %v97_v20, %v91_v19 }
  0x8b   :  { %1086 = vmatpush1.bf16.msra.mxu1 %v1777_v50 }
  0x8c   :  { %1087 = vmatprep.subr.bf16.mxu1 %v1782_v51 }
  0x8d   :  { %813 = vmatpush1.bf16.msra.mxu0 %v1705_v27  ;;  %v96_v27 = vld [vmem:[#allocation3 + $0xb0] sm:$0xff] }
  0x8e   :  { %814 = vmatprep.subr.bf16.mxu0 %v1713_v29  ;;  %v108_v28 = vpack.c.bf16 %v96_v27, %v90_v26  ;;  %v1807_v29 = vld [vmem:[#allocation8 + $0xc0] ss:$8 sps:$4 sm:$0xff]  }
  0x8f   :  { %1088 = vmatpush1.bf16.msra.mxu1 %v1780_v54 }
  0x90   :  { %1089 = vmatprep.subr.bf16.mxu1 %v1785_v55  ;;  %v208_v55 = vlaneseq }
  0x91   :  { %815 = vmatpush1.bf16.msra.mxu0 %v1711_v36  ;;  %v1816_v36 = vld [vmem:[#allocation8 + $0xf0] ss:$8 sps:$4 sm:$0xff]  }
  0x92   :  { %816 = vmatprep.subr.bf16.mxu0 %v1719_v37  ;;  %v1819_v37 = vld [vmem:[%s2189_s5 + $0x40] sm:$0xff]  }
  0x93   :  { %1090 = vmatpush1.bf16.msra.mxu1 %v1783_v58  ;;  %v206_v58 = vld [vmem:[%s2186_s2] sm:$0x3] }
  0x94   :  { %1091 = vmatprep.subr.bf16.mxu1 %v1788_v59 }
  0x95   :  { %817 = vmatpush1.bf16.msra.mxu0 %v1717_v40  ;;  %v2075_v40 = vld [vmem:[%s2189_s5 + $0x8] sm:$0xff]  }
  0x96   :  { %818 = vmatprep.subr.bf16.mxu0 %v1725_v42  ;;  %v2087_v42 = vld [vmem:[%s2189_s5 + $0x10] sm:$0xff]  }
  0x97   :  { %1092 = vmatpush1.bf16.msra.mxu1 %v1786_v62 }
  0x98   :  { %1093 = vmatprep.subr.bf16.mxu1 %v1791_v63 }
  0x99   :  { %819 = vmatpush1.bf16.msra.mxu0 %v1723_v47 }
  0x9a   :  { %820 = vmatprep.subr.bf16.mxu0 %v1731_v48 }
  0x9b   :  { %1094 = vmatpush1.bf16.msra.mxu1 %v1789_v2 }
  0x9c   :  { %1095 = vmatprep.subr.bf16.mxu1 %v1794_v3 }
  0x9d   :  { %821 = vmatpush1.bf16.msra.mxu0 %v1729_v52 }
  0x9e   :  { %822 = vmatprep.subr.bf16.mxu0 %v1737_v53 }
  0x9f   :  { %1096 = vmatpush1.bf16.msra.mxu1 %v1792_v6 }
  0xa0   :  { %1097 = vmatprep.subr.bf16.mxu1 %v1797_v7 }
  0xa1   :  { %823 = vmatpush1.bf16.msra.mxu0 %v1735_v56  ;;  %v2115_v56 = vshrl.u32 %v208_v55, 7 }
  0xa2   :  { %824 = vmatprep.subr.bf16.mxu0 %v1743_v57 }
  0xa3   :  { %1098 = vmatpush1.bf16.msra.mxu1 %v1795_v10  ;;  %v210_v57 = vsub.s32 0, %v2115_v56  ;;  %v214_v59 = vsub.s32 1, %v2115_v56 }
  0xa4   :  { %1099 = vmatprep.subr.bf16.mxu1 %v1800_v11 }
  0xa5   :  { %825 = vmatpush1.bf16.msra.mxu0 %v1741_v60  ;;  %v211_v60 = vrot.slane %v206_v58, %v210_v57 }
  0xa6   :  { %826 = vmatprep.subr.bf16.mxu0 %v1749_v61  ;;  %v215_v61 = vrot.slane %v206_v58, %v214_v59 }
  0xa7   :  { %1100 = vmatpush1.bf16.msra.mxu1 %v1798_v14 }
  0xa8   :  { %1101 = vmatprep.subr.bf16.mxu1 %v1803_v15 }
  0xa9   :  { %827 = vmatpush1.bf16.msra.mxu0 %v1747_v0 }
  0xaa   :  { %828 = vmatprep.subr.bf16.mxu0 %v1755_v1 }
  0xab   :  { %1102 = vmatpush1.bf16.msra.mxu1 %v1801_v21 }
  0xac   :  { %1103 = vmatprep.subr.bf16.mxu1 %v1806_v22 }
  0xad   :  { %829 = vmatpush1.bf16.msra.mxu0 %v1753_v4 }
  0xae   :  { %830 = vmatprep.subr.bf16.mxu0 %v1761_v5 }
  0xaf   :  { %1104 = vmatpush1.bf16.msra.mxu1 %v1804_v25 }
  0xb0   :  { %1105 = vmatprep.subr.bf16.mxu1 %v1809_v30 }
  0xb1   :  { %831 = vmatpush1.bf16.msra.mxu0 %v1759_v8 }
  0xb2   :  { %832 = vmatprep.subr.bf16.mxu0 %v1767_v9 }
  0xb3   :  { %1106 = vmatpush1.bf16.msra.mxu1 %v1807_v29 }
  0xb4   :  { %1107 = vmatprep.subr.bf16.mxu1 %v1812_v31 }
  0xb5   :  { %833 = vmatpush1.bf16.msra.mxu0 %v1765_v12 }
  0xb6   :  { %834 = vmatprep.subr.bf16.mxu0 %v1770_v13 }
  0xb7   :  { %1108 = vmatpush1.bf16.msra.mxu1 %v1810_v32 }
  0xb8   :  { %1109 = vmatprep.subr.bf16.mxu1 %v1815_v33 }
  0xb9   :  { %835 = vmatpush1.bf16.msra.mxu0 %v1768_v16 }
  0xba   :  { %1548 = vmatprep.subr.bf16.mxu0 %v1819_v37 }
  0xbb   :  { %1110 = vmatpush1.bf16.msra.mxu1 %v1813_v34 }
  0xbc   :  { %837 = vmatmul.mubr.bf16.vlgmr.msra.gmra.mrb[0].mxu0 %v102_v23  ;;  %1111 = vmatprep.subr.bf16.mxu1 %v1818_v35 }
  0xbd   :  { %846 = vmatprep.mubr.bf16.mxu0 %v109_v24  ;;  %1549 = vmatpush3.bf16.msra.mxu0 %v2064_v38 }
  0xbe   :  { %1550 = vmatprep.subr.bf16.mxu0 %v2069_v39 }
  0xbf   :  { %1112 = vmatpush1.bf16.msra.mxu1 %v1816_v36 }
  0xc0   :  { %1576 = vmatprep.subr.bf16.mxu1 %v1819_v37 }
  0xc1   :  { %1551 = vmatpush3.bf16.msra.mxu0 %v2075_v40 }
  0xc2   :  { %1552 = vmatprep.subr.bf16.mxu0 %v2081_v41 }
  0xc4   :  { %847 = vmatmul.mubr.bf16.gmra.mrb[4].mxu0 %v108_v28 }
  0xc5   :  { %1553 = vmatpush3.bf16.msra.mxu0 %v2087_v42 }
  0xc6   :  { %1554 = vmatprep.subr.bf16.mxu0 %v2093_v43 }
  0xc9   :  { %1555 = vmatpush3.bf16.msra.mxu0 %v2099_v44 }
  0xca   :  { %1556 = vmatprep.subr.bf16.mxu0 %v2105_v45 }
  0xcd   :  { %1557 = vmatpush3.bf16.msra.mxu0 %v2111_v46 }
 0x154   :  { %v732_v47 = vpop.f32.mrb[0].mxu1 }
 0x155   :  { %v734_v48 = vpop.f32.mrb[1].mxu1  ;;  %v733_v62 = vadd.f32 %v732_v47, %v211_v60 }
 0x156   :  { %v736_v49 = vpop.f32.mrb[2].mxu1  ;;  %v735_v63 = vadd.f32 %v734_v48, %v215_v61 }
 0x157   :  { %v738_v50 = vpop.f32.mrb[3].mxu1  ;;  %v737_v1 = vadd.f32 %v736_v49, %v211_v60 }
 0x158   :  { %v739_v4 = vadd.f32 %v738_v50, %v215_v61 }
 0x15c   :  { %v742_v51 = vpop.f32.mrb[4].mxu1 }
 0x15d   :  { %v744_v52 = vpop.f32.mrb[5].mxu1  ;;  %v743_v13 = vadd.f32 %v742_v51, %v211_v60 }
 0x15e   :  { %v746_v53 = vpop.f32.mrb[6].mxu1  ;;  %v745_v15 = vadd.f32 %v744_v52, %v215_v61 }
 0x15f   :  { %v748_v54 = vpop.f32.mrb[7].mxu1  ;;  %v747_v22 = vadd.f32 %v746_v53, %v211_v60 }
 0x160   :  { %v749_v26 = vadd.f32 %v748_v54, %v215_v61 }
 0x18f   :  { %v838_v0 = vpop.f32.mrb[0].mxu0 }
 0x190   :  { %v1593_v2 = vadd.f32 %v838_v0, %v733_v62  ;;  %v840_v3 = vpop.f32.mrb[1].mxu0 }
 0x191   :  { %v1595_v5 = vadd.f32 %v840_v3, %v735_v63  ;;  %v842_v6 = vpop.f32.mrb[2].mxu0 }
 0x192   :  { %v857_v7 = vmax.f32 %v1593_v2, 0.0  ;;  %v1597_v8 = vadd.f32 %v842_v6, %v737_v1  ;;  %v844_v9 = vpop.f32.mrb[3].mxu0 }
 0x193   :  { %v858_v10 = vmax.f32 %v1595_v5, 0.0  ;;  %v1599_v11 = vadd.f32 %v844_v9, %v739_v4 }
 0x194   :  { %v859_v12 = vmax.f32 %v1597_v8, 0.0  ;;  %v865_v16 = vmin.f32 %v857_v7, 6.0 }
 0x195   :  { %v860_v14 = vmax.f32 %v1599_v11, 0.0  ;;  %v866_v18 = vmin.f32 %v858_v10, 6.0 }
 0x196   :  { %v867_v17 = vmin.f32 %v859_v12, 6.0 }
 0x197   :  { %v868_v19 = vmin.f32 %v860_v14, 6.0  ;;  %v848_v20 = vpop.f32.mrb[4].mxu0 }
 0x198   :  { %v873_v21 = vpack.c.bf16 %v867_v17, %v865_v16  ;;  %v1601_v23 = vadd.f32 %v848_v20, %v743_v13  ;;  %v850_v24 = vpop.f32.mrb[5].mxu0 }
 0x199   :  { %v874_v25 = vpack.c.bf16 %v868_v19, %v866_v18  ;;  %v1603_v27 = vadd.f32 %v850_v24, %v745_v15  ;;  %v852_v28 = vpop.f32.mrb[6].mxu0 }
 0x19a   :  { %v861_v29 = vmax.f32 %v1601_v23, 0.0  ;;  %v1605_v30 = vadd.f32 %v852_v28, %v747_v22  ;;  %v854_v31 = vpop.f32.mrb[7].mxu0 }
 0x19b   :  { %v862_v32 = vmax.f32 %v1603_v27, 0.0  ;;  %v1607_v33 = vadd.f32 %v854_v31, %v749_v26  ;;  %1113 = vmatprep.mubr.bf16.mxu1 %v874_v25 }
 0x19c   :  { %v863_v34 = vmax.f32 %v1605_v30, 0.0  ;;  %1114 = vmatmul.mubr.bf16.vlgmr.msra.gmra.mrb[8].mxu1 %v873_v21  ;;  %v869_v36 = vmin.f32 %v861_v29, 6.0 }
 0x19d   :  { %v864_v35 = vmax.f32 %v1607_v33, 0.0  ;;  %1584 = vmatpush3.bf16.msra.mxu1 %v2064_v38  ;;  %v870_v47 = vmin.f32 %v862_v32, 6.0  ;;  %v1829_v38 = vld [vmem:[%s2189_s5 + $0x68] sm:$0xff]  }
 0x19e   :  { %v871_v37 = vmin.f32 %v863_v34, 6.0  ;;  %1577 = vmatprep.subr.bf16.mxu1 %v2069_v39  ;;  %v1830_v39 = vld [vmem:[%s2189_s5 + $0x28] sm:$0xff]   ;;  %1558 = vmatprep.subr.bf16.mxu0 %v1829_v38 }
 0x19f   :  { %v872_v48 = vmin.f32 %v864_v35, 6.0  ;;  %1559 = vmatpush3.bf16.msra.mxu0 %v1830_v39 }
 0x1a0   :  { %v875_v49 = vpack.c.bf16 %v871_v37, %v869_v36 }
 0x1a1   :  { %v876_v50 = vpack.c.bf16 %v872_v48, %v870_v47  ;;  %1585 = vmatpush3.bf16.msra.mxu1 %v2075_v40  ;;  %v1831_v40 = vld [vmem:[%s2189_s5 + $0x70] sm:$0xff]  }
 0x1a2   :  { %1578 = vmatprep.subr.bf16.mxu1 %v2081_v41  ;;  %v1832_v41 = vld [vmem:[%s2189_s5 + $0x30] sm:$0xff]   ;;  %1560 = vmatprep.subr.bf16.mxu0 %v1831_v40 }
 0x1a3   :  { %1123 = vmatprep.mubr.bf16.mxu1 %v876_v50  ;;  %1561 = vmatpush3.bf16.msra.mxu0 %v1832_v41 }
 0x1a4   :  { %1124 = vmatmul.mubr.bf16.gmra.mrb[12].mxu1 %v875_v49 }
 0x1a5   :  { %1586 = vmatpush3.bf16.msra.mxu1 %v2087_v42  ;;  %v1833_v42 = vld [vmem:[%s2189_s5 + $0x78] sm:$0xff]  }
 0x1a6   :  { %1579 = vmatprep.subr.bf16.mxu1 %v2093_v43  ;;  %v1834_v43 = vld [vmem:[%s2189_s5 + $0x38] sm:$0xff]   ;;  %1562 = vmatprep.subr.bf16.mxu0 %v1833_v42 }
 0x1a7   :  { %1563 = vmatpush3.bf16.msra.mxu0 %v1834_v43 }
 0x1a9   :  { %1587 = vmatpush3.bf16.msra.mxu1 %v2099_v44  ;;  %v909_v44 = vld [vmem:[%s2188_s4] sm:$0x3]  ;;  %s1964_s4 = smov [#allocation9]  }
 0x1aa   :  { %1580 = vmatprep.subr.bf16.mxu1 %v2105_v45  ;;  %v914_v45 = vrot.slane %v909_v44, %v210_v57  ;;  %s1375_s5 = sshll.u32 %s1964_s4, 4  ;;  %s1376_s5 = int_to_ptr.vmem [resolvable:$true] %s1375_s5 }
 0x1ab   :  { %s1905_s29 = scalar_lea.vmem %s1376_s5, 1024  ;;  %p1910_p11 = scmp.lt.s32.totalorder %s1376_s5, %s1376_s5 }
 0x1ac   :  { %p1906_p10 = scmp.ne.s32.totalorder %s1376_s5, %s1905_s29  ;;  %p1911_p12 = scmp.lt.s32.totalorder %s1905_s29, %s1905_s29 }
 0x1ad   :  { %1588 = vmatpush3.bf16.msra.mxu1 %v2111_v46  ;;  %v918_v46 = vrot.slane %v909_v44, %v214_v59 }
 0x1ae   :  { %1581 = vmatprep.subr.bf16.mxu1 %v1829_v38  ;;  %p1912_p13 = por %p1911_p12, %p1910_p11 }
 0x1b0   :  { %p1913_p0 = pnand %p1912_p13, %p1906_p10 }
 0x1b1   :  { %1589 = vmatpush3.bf16.msra.mxu1 %v1830_v39 }
 0x1b2   :  { %1582 = vmatprep.subr.bf16.mxu1 %v1831_v40 }
 0x1b5   :  { %1590 = vmatpush3.bf16.msra.mxu1 %v1832_v41 }
 0x1b6   :  { %1583 = vmatprep.subr.bf16.mxu1 %v1833_v42 }
 0x1b9   :  { %1591 = vmatpush3.bf16.msra.mxu1 %v1834_v43 }
 0x26f   :  { %v1115_v51 = vpop.f32.mrb[8].mxu1 }
 0x270   :  { %v1116_v52 = vadd.f32 %v1115_v51, %v914_v45  ;;  %v1117_v53 = vpop.f32.mrb[9].mxu1 }
 0x271   :  { %v1118_v54 = vadd.f32 %v1117_v53, %v918_v46  ;;  %v1119_v55 = vpop.f32.mrb[10].mxu1 }
 0x272   :  { %v1134_v58 = vmax.f32 %v1116_v52, 0.0  ;;  %v1120_v60 = vadd.f32 %v1119_v55, %v914_v45  ;;  %v1121_v61 = vpop.f32.mrb[11].mxu1 }
 0x273   :  { %v1135_v62 = vmax.f32 %v1118_v54, 0.0  ;;  %v1122_v63 = vadd.f32 %v1121_v61, %v918_v46 }
 0x274   :  { %v1142_v0 = vmin.f32 %v1134_v58, 6.0  ;;  %v1136_v1 = vmax.f32 %v1120_v60, 0.0 }
 0x275   :  { %v1143_v2 = vmin.f32 %v1135_v62, 6.0  ;;  %v1137_v3 = vmax.f32 %v1122_v63, 0.0 }
 0x276   :  { %1150 = vst [vmem:[#allocation9] sm:$0xff] %v1142_v0  ;;  %v1144_v4 = vmin.f32 %v1136_v1, 6.0 }
 0x277   :  { %1151 = vst [vmem:[#allocation9 + $0x8] sm:$0xff] %v1143_v2  ;;  %v1145_v57 = vmin.f32 %v1137_v3, 6.0  ;;  %v1125_v56 = vpop.f32.mrb[12].mxu1 }
 0x278   :  { %1152 = vst [vmem:[#allocation9 + $0x10] sm:$0xff] %v1144_v4  ;;  %v1158_v59 = vpack.c.bf16 %v1144_v4, %v1142_v0  ;;  %v1126_v5 = vadd.f32 %v1125_v56, %v914_v45  ;;  %v1127_v6 = vpop.f32.mrb[13].mxu1 }
 0x279   :  { %1153 = vst [vmem:[#allocation9 + $0x18] sm:$0xff] %v1145_v57  ;;  %v1159_v7 = vpack.c.bf16 %v1145_v57, %v1143_v2  ;;  %v1128_v8 = vadd.f32 %v1127_v6, %v918_v46  ;;  %v1129_v9 = vpop.f32.mrb[14].mxu1 }
 0x27a   :  { %v1138_v10 = vmax.f32 %v1126_v5, 0.0  ;;  %v1130_v11 = vadd.f32 %v1129_v9, %v914_v45  ;;  %v1131_v12 = vpop.f32.mrb[15].mxu1 }
 0x27b   :  { %v1139_v13 = vmax.f32 %v1128_v8, 0.0  ;;  %v1132_v14 = vadd.f32 %v1131_v12, %v918_v46  ;;  %1329 = vmatprep.mubr.bf16.mxu0 %v1159_v7 }
 0x27c   :  { %v1146_v15 = vmin.f32 %v1138_v10, 6.0  ;;  %v1140_v16 = vmax.f32 %v1130_v11, 0.0  ;;  %1330 = vmatmul.mubr.bf16.vlgmr.msra.gmra.mrb[8].mxu0 %v1158_v59 }
 0x27d   :  { %v1147_v17 = vmin.f32 %v1139_v13, 6.0  ;;  %v1141_v18 = vmax.f32 %v1132_v14, 0.0 }
 0x27e   :  { %1154 = vst [vmem:[#allocation9 + $0x20] sm:$0xff] %v1146_v15  ;;  %v1148_v19 = vmin.f32 %v1140_v16, 6.0 }
 0x27f   :  { %1155 = vst [vmem:[#allocation9 + $0x28] sm:$0xff] %v1147_v17  ;;  %v1149_v20 = vmin.f32 %v1141_v18, 6.0 }
 0x280   :  { %1156 = vst [vmem:[#allocation9 + $0x30] sm:$0xff] %v1148_v19  ;;  %v1160_v21 = vpack.c.bf16 %v1148_v19, %v1146_v15 }
 0x281   :  { %1157 = vst [vmem:[#allocation9 + $0x38] sm:$0xff] %v1149_v20  ;;  %v1161_v22 = vpack.c.bf16 %v1149_v20, %v1147_v17 }
 0x283   :  { %1337 = vmatprep.mubr.bf16.mxu1 %v1161_v22 }
 0x284   :  { %1338 = vmatmul.mubr.bf16.vlgmr.msra.gmra.mrb[16].mxu1 %v1160_v21 }
 0x285   :  { %1916 = shalt.err (!%p1913_p0)
}
 0x286   :  { %s1917_s9 = scalar_lea.hbm %s2191_s7, 1024 }
 0x287   :  { %p1918_p1 = scmp.ne.s32.totalorder %s2191_s7, %s1917_s9  ;;  %p1921_p2 = scmp.lt.u32.totalorder %s1917_s9, %s2191_s7 }
 0x289   :  { %p1923_p3 = pnand %p1921_p2, %p1918_p1 }
 0x28b   :  { %1926 = shalt.err (!%p1923_p3)
}
 0x28c   :  { %s1965_s14 = smov 256   ;;  %s1966_s15 = smov 16   ;;  %v1530_v24 = vld [vmem:[#allocation2] ss:$0 sm:$0xff]  ;;  %vm1346_vm0 = vcmask 7168   ;;  %vm1368_vm1 = vcmask 0  }
 0x28d   :  { %1381 = dma.vmem_to_hbm [thread:$0]  %s1376_s5, 1024, %s2191_s7, [#allocation5], %s1965_s14, %s1965_s14, %s1966_s15  }
 0x28e   :  { %s1967_s7 = smov [#allocation10]  }
 0x28f   :  { %s1388_s19 = sshll.u32 %s1967_s7, 4  ;;  %s1389_s19 = int_to_ptr.vmem [resolvable:$true] %s1388_s19 }
 0x290   :  { %s1927_s2 = scalar_lea.vmem %s1389_s19, 16  ;;  %s1931_s20 = scalar_lea.vmem %s1389_s19, 32 }
 0x291   :  { %p1928_p4 = scmp.ne.s32.totalorder %s1389_s19, %s1927_s2  ;;  %p1932_p5 = scmp.lt.s32.totalorder %s1389_s19, %s1389_s19 }
 0x292   :  { %p1933_p6 = scmp.lt.s32.totalorder %s1931_s20, %s1927_s2 }
 0x294   :  { %p1934_p7 = por %p1933_p6, %p1932_p5 }
 0x296   :  { %p1935_p8 = pnand %p1934_p7, %p1928_p4 }
 0x34f   :  { %v1564_v23 = vpop.f32.mrb[8].mxu0 }
 0x350   :  { %v1565_v25 = vpop.f32.mrb[9].mxu0 }
 0x351   :  { %v1566_v26 = vadd.f32 %v1565_v25, %v1564_v23  ;;  %v1567_v27 = vpop.f32.mrb[10].mxu0 }
 0x352   :  { %v1568_v28 = vpop.f32.mrb[11].mxu0 }
 0x353   :  { %v1332_v29 = vadd.f32 %v1566_v26, %v1530_v24  ;;  %v1569_v30 = vadd.f32 %v1568_v28, %v1567_v27 }
 0x355   :  { %v1335_v31 = vadd.f32 %v1569_v30, %v1530_v24  ;;  %v1347_v32 = vsel %vm1346_vm0, %v1332_v29, 0.0 }
 0x357   :  { %v1348_v33 = vsel %vm1346_vm0, %v1335_v31, 0.0  ;;  %v1570_v34 = vpop.f32.mrb[16].mxu1 }
 0x358   :  { %v1349_v35 = vadd.f32 %v1348_v33, %v1347_v32  ;;  %v1571_v36 = vpop.f32.mrb[17].mxu1 }
 0x359   :  { %v1572_v37 = vadd.f32 %v1571_v36, %v1570_v34  ;;  %v1573_v47 = vpop.f32.mrb[18].mxu1 }
 0x35a   :  { %v1574_v48 = vpop.f32.mrb[19].mxu1 }
 0x35b   :  { %v1340_v49 = vadd.f32 %v1572_v37, %v1530_v24  ;;  %v1575_v50 = vadd.f32 %v1574_v48, %v1573_v47 }
 0x35d   :  { %v1350_v38 = vsel %vm1346_vm0, %v1340_v49, 0.0  ;;  %v1343_v39 = vadd.f32 %v1575_v50, %v1530_v24 }
 0x35e   :  { %v1351_v40 = vadd.f32 %v1350_v38, %v1349_v35 }
 0x35f   :  { %v1352_v41 = vsel %vm1346_vm0, %v1343_v39, 0.0 }
 0x360   :  { %v1353_v42 = vadd.f32 %v1352_v41, %v1351_v40 }
 0x362   :  { %v1354_v43 = vrot.slane %v1353_v42, 4 }
 0x364   :  { %v1355_v44 = vadd.f32 %v1354_v43, %v1353_v42 }
 0x366   :  { %v1356_v45 = vrot.slane %v1355_v44, 2 }
 0x368   :  { %v1357_v46 = vadd.f32 %v1356_v45, %v1355_v44 }
 0x36a   :  { %v1358_v51 = vrot.slane %v1357_v46, 1 }
 0x36c   :  { %v1359_v52 = vadd.f32 %v1358_v51, %v1357_v46 }
 0x36e   :  { %v1547_v53 = vmul.f32 -0.03125, %v1359_v52 }
 0x370   :  { %v1363_v54 = vmul.f32 1.442695, %v1547_v53 }
 0x372   :  { %1835 = vpow2.f32 %v1363_v54 }
 0x37c   :  { %v1836_v55 = vpop.eup %1835 }
 0x37d   :  { %v1365_v58 = vadd.f32 1.0, %v1836_v55 }
 0x37f   :  { %1837 = vrcp.f32 %v1365_v58 }
 0x389   :  { %v1838_v60 = vpop.eup %1837 }
 0x38a   :  { %1369 = vst.msk [vmem:[#allocation10] sm:$0x1] %vm1368_vm1, %v1838_v60 }
 0x38b   :  { %1938 = shalt.err (!%p1935_p8)
}
 0x38c   :  { %s1939_s21 = scalar_lea.hbm %s2192_s8, 16 }
 0x38d   :  { %p1940_p9 = scmp.ne.s32.totalorder %s2192_s8, %s1939_s21  ;;  %p1943_p10 = scmp.lt.u32.totalorder %s1939_s21, %s2192_s8 }
 0x38f   :  { %p1945_p11 = pnand %p1943_p10, %p1940_p9 }
 0x391   :  { %1948 = shalt.err (!%p1945_p11)
}
 0x392   :  { %1391 = dma.vmem_to_hbm [thread:$0]  %s1389_s19, 16, %s2192_s8, [#allocation11]  }
 0x393   :  { %1953 = dma.done.wait [#allocation5], 1024  }
 0x394   :  { %1954 = vsyncadd [#allocation5], 4294966272 }
 0x395   :  { %1955 = dma.done.wait [#allocation11], 16  }
 0x396   :  { %1956 = vsyncadd [#allocation11], 4294967280 }
 0x397   :  { %1398 = vsyncpa [#allocation4], 1 }
 0x398   :  { %1399 = vsyncpa [#allocation7], 1 }
 0x399   :  { %1400 = vsyncpa [#allocation5], 1 }
 0x39a   :  { %1401 = vsyncpa [#allocation11], 1 }

</bundles_post_ra>
